<compile_context>
chip_gen: v6e
topology: v6e:2x2x1
jax: 0.10.0
libtpu: 0.0.40
codegen_flags: <defaults>
</compile_context>

<pallas_src>
import jax
import jax.numpy as jnp
from jax import lax
from jax.experimental import pallas as pl
from jax.experimental.pallas import tpu as pltpu


def _logreg_kernel(x_ref, w_ref, b_ref, o_ref):
    # x_ref: (TB, F) VMEM   w_ref: (1, F) VMEM   b_ref: (1, 1) SMEM   o_ref: (1, TB) VMEM
    # Contract the feature axis of w against the feature axis of x so the
    # batch tile lands on the lane (N) dimension -> lane-dense (1, TB) result.
    z = lax.dot_general(
        w_ref[...], x_ref[...],
        dimension_numbers=(((1,), (1,)), ((), ())),
        preferred_element_type=jnp.float32,
    )                                   # (1, TB), f32 accumulate
    z = z + b_ref[0, 0]                 # scalar bias from SMEM
    o_ref[...] = jax.nn.sigmoid(z).astype(o_ref.dtype)


def logistic_regression(x, w, b, *, block_b=512, vmem_limit_bytes=None):
    """Forward pass of LogisticRegression.

    x: (B, F) float32
    w: (1, F) float32   (PyTorch nn.Linear(F, 1).weight layout)
    b: (1, 1) float32   (bias)
    returns: (B, 1) float32  == sigmoid(x @ w.T + b)
    """
    B, F = x.shape
    assert w.shape == (1, F)
    assert b.shape == (1, 1)

    # Batch tile: multiple of 128 (lane-dense output blocks), capped at block_b.
    TB = min(block_b, pl.cdiv(B, 128) * 128)
    B_pad = pl.cdiv(B, TB) * TB
    if B_pad != B:
        x = jnp.pad(x, ((0, B_pad - B), (0, 0)))

    out = pl.pallas_call(
        _logreg_kernel,
        out_shape=jax.ShapeDtypeStruct((1, B_pad), jnp.float32),
        grid_spec=pltpu.PrefetchScalarGridSpec(
            num_scalar_prefetch=0,
            grid=(B_pad // TB,),
            in_specs=[
                # x: tiled along batch, pipelined (double-buffered) per grid step.
                pl.BlockSpec((TB, F), lambda i: (i, 0)),
                # w: constant index_map -> stays VMEM-resident across steps.
                pl.BlockSpec((1, F), lambda i: (0, 0)),
                # bias: single scalar in SMEM.
                pl.BlockSpec(memory_space=pltpu.MemorySpace.SMEM),
            ],
            out_specs=pl.BlockSpec((1, TB), lambda i: (0, i)),
        ),
        compiler_params=pltpu.CompilerParams(
            dimension_semantics=("parallel",),
            vmem_limit_bytes=vmem_limit_bytes,
        ),
    )(x, w, b)

    # Layout plumbing back to the PyTorch output shape (B, 1).
    return out[0, :B].reshape(B, 1)


if __name__ == "__main__":
    key = jax.random.PRNGKey(0)
    kx, kw, kb = jax.random.split(key, 3)

    batch = 8
    n_input_features = 32

    x = jax.random.normal(kx, (batch, n_input_features), dtype=jnp.float32)
    # Parameters with nn.Linear(n_input_features, 1) layout: weight (1, F), bias (1, 1).
    w = jax.random.normal(kw, (1, n_input_features), dtype=jnp.float32) * 0.1
    b = jax.random.normal(kb, (1, 1), dtype=jnp.float32) * 0.1

    y = logistic_regression(x, w, b)
    jax.block_until_ready(y)

    # Reference in plain JAX (same semantics as torch.sigmoid(self.linear(x))).
    y_ref = jax.nn.sigmoid(x @ w.T + b)
    assert y.shape == (batch, 1)
    assert jnp.allclose(y, y_ref, atol=1e-6, rtol=1e-5)

    print("KERNEL_OK")
</pallas_src>

<mosaic_0001>
module attributes {stable_mosaic.version = 11 : i64} {
  func.func @_logreg_kernel(%arg0: i32, %arg1: memref<128x32xf32, #tpu.memory_space<vmem>>, %arg2: memref<1x32xf32, #tpu.memory_space<vmem>>, %arg3: memref<1x1xf32, #tpu.memory_space<smem>>, %arg4: memref<1x128xf32, #tpu.memory_space<vmem>>) attributes {dimension_semantics = [#tpu.dimension_semantics<parallel>], iteration_bounds = array<i64: 1>, scalar_prefetch = 0 : i64, scratch_operands = 0 : i64, tpu.core_type = #tpu.core_type<tc>, window_params = [{transform_indices = @transform_0, window_bounds = array<i64: 128, 32>}, {pipeline_mode = #tpu.pipeline_mode<synchronous>, transform_indices = @transform_1, window_bounds = array<i64: 1, 32>}, {transform_indices = @transform_2, window_bounds = array<i64: 1, 1>}, {transform_indices = @transform_3, window_bounds = array<i64: 1, 128>}]} {
    %c0 = arith.constant 0 : index
    %c0_0 = arith.constant 0 : index
    %0 = vector.load %arg2[%c0, %c0_0] : memref<1x32xf32, #tpu.memory_space<vmem>>, vector<1x32xf32>
    %c0_1 = arith.constant 0 : index
    %c0_2 = arith.constant 0 : index
    %1 = vector.load %arg1[%c0_1, %c0_2] : memref<128x32xf32, #tpu.memory_space<vmem>>, vector<128x32xf32>
    %cst = arith.constant dense<0.000000e+00> : vector<1x128xf32>
    %2 = tpu.matmul %0, %1, %cst {dimension_numbers = #tpu.dot_dimension_numbers<[1], [1], [0], [0], [0, 0, 1, 0], [], []>} : vector<1x32xf32>, vector<128x32xf32>, vector<1x128xf32> -> vector<1x128xf32>
    %c0_3 = arith.constant 0 : index
    %c0_4 = arith.constant 0 : index
    %3 = memref.load %arg3[%c0_3, %c0_4] : memref<1x1xf32, #tpu.memory_space<smem>>
    %4 = vector.broadcast %3 : f32 to vector<1x128xf32>
    %5 = arith.addf %2, %4 : vector<1x128xf32>
    %6 = arith.negf %5 : vector<1x128xf32>
    %7 = math.exp %6 : vector<1x128xf32>
    %cst_5 = arith.constant 1.000000e+00 : f32
    %8 = vector.broadcast %cst_5 : f32 to vector<1x128xf32>
    %9 = arith.addf %8, %7 : vector<1x128xf32>
    %10 = arith.divf %8, %9 : vector<1x128xf32>
    %c0_6 = arith.constant 0 : index
    %c0_7 = arith.constant 0 : index
    %11 = vector.load %arg4[%c0_6, %c0_7] : memref<1x128xf32, #tpu.memory_space<vmem>>, vector<1x128xf32>
    tpu.vector_store %arg4[%c0_6, %c0_7], %10 {strides = array<i32>} : memref<1x128xf32, #tpu.memory_space<vmem>>, vector<1x128xf32>,
    return
  }
  func.func @transform_0(%arg0: i32) -> (i32, i32) {
    %c0_i32 = arith.constant 0 : i32
    %c0_i32_0 = arith.constant 0 : i32
    return %arg0, %c0_i32 : i32, i32
  }
  func.func @transform_1(%arg0: i32) -> (i32, i32) {
    %c0_i32 = arith.constant 0 : i32
    %c0_i32_0 = arith.constant 0 : i32
    %c0_i32_1 = arith.constant 0 : i32
    return %c0_i32, %c0_i32_0 : i32, i32
  }
  func.func @transform_2(%arg0: i32) -> (i32, i32) {
    %c0_i32 = arith.constant 0 : i32
    %c0_i32_0 = arith.constant 0 : i32
    %c0_i32_1 = arith.constant 0 : i32
    return %c0_i32, %c0_i32_0 : i32, i32
  }
  func.func @transform_3(%arg0: i32) -> (i32, i32) {
    %c0_i32 = arith.constant 0 : i32
    %c0_i32_0 = arith.constant 0 : i32
    return %c0_i32, %arg0 : i32, i32
  }
}

</mosaic_0001>

<bundles_post_ra>
// kernel: tpu_custom_call.1
= control target key start
LH: loop header
LB: loop body
LE: loop exit
PB: predicated region body
PF: predicated region fallthrough
CT: control target
= control target key end

     0   :  { %vm35_vm0 = vcmask 261120   ;;  %v277_v1 = vmov 0.0   ;;  %vm278_vm1 = vmmov 0   ;;  %s374_s0 = inlined_call_operand.vmem [shape: f32[128,32], index: 0, kind: input, shape index: {}]   ;;  %s375_s1 = inlined_call_operand.vmem [shape: f32[1,32], index: 1, kind: input, shape index: {}]   ;;  %s376_s2 = inlined_call_operand.<no memory space> [shape: f32[1,1], index: 2, kind: input, shape index: {}]   ;;  %s377_s3 = inlined_call_operand.hbm [shape: f32[1,128], index: 3, kind: output, shape index: {}]  }
   0x1   :  { %v32_v0 = vld [vmem:[%s374_s0 + $0x78] sm:$0xff]  ;;  %213 = vmatprep.subr.mxu0 %v277_v1  ;;  %245 = vmatprep.mubr.msk.f32.mxu0 %vm278_vm1, %v277_v1  ;;  %v31_v2 = vld [vmem:[%s374_s0 + $0x70] sm:$0xff] }
   0x2   :  { %214 = vmatpush3.xpose.msk.msra.mxu0 %vm35_vm0, %v32_v0 }
   0x3   :  { %215 = vmatprep.subr.mxu0 %v277_v1 }
   0x4   :  { %9 = vsyncpa [#allocation4], 0  ;;  %v30_v3 = vld [vmem:[%s374_s0 + $0x68] sm:$0xff]  ;;  %v29_v4 = vld [vmem:[%s374_s0 + $0x60] sm:$0xff]  ;;  %v34_v18 = vstv %s376_s2 }
   0x5   :  { %v28_v5 = vld [vmem:[%s374_s0 + $0x58] sm:$0xff]  ;;  %v27_v6 = vld [vmem:[%s374_s0 + $0x50] sm:$0xff]  ;;  %v26_v7 = vld [vmem:[%s374_s0 + $0x48] sm:$0xff] }
   0x6   :  { %216 = vmatpush3.xpose.msk.msra.mxu0 %vm35_vm0, %v31_v2  ;;  %v25_v8 = vld [vmem:[%s374_s0 + $0x40] sm:$0xff]  ;;  %v24_v9 = vld [vmem:[%s374_s0 + $0x38] sm:$0xff]  ;;  %v23_v10 = vld [vmem:[%s374_s0 + $0x30] sm:$0xff] }
   0x7   :  { %217 = vmatprep.subr.mxu0 %v277_v1  ;;  %v22_v11 = vld [vmem:[%s374_s0 + $0x28] sm:$0xff]  ;;  %v21_v12 = vld [vmem:[%s374_s0 + $0x20] sm:$0xff]  ;;  %v20_v13 = vld [vmem:[%s374_s0 + $0x18] sm:$0xff] }
   0x8   :  { %v19_v14 = vld [vmem:[%s374_s0 + $0x10] sm:$0xff]  ;;  %v18_v15 = vld [vmem:[%s374_s0 + $0x8] sm:$0xff]  ;;  %v17_v16 = vld [vmem:[%s374_s0] sm:$0xff]  ;;  %s279_s0 = smov [#allocation3]  }
   0x9   :  { %v16_v17 = vld [vmem:[%s375_s1] sm:$0x1]  ;;  %s170_s21 = sshll.u32 %s279_s0, 4  ;;  %s171_s21 = int_to_ptr.vmem [resolvable:$true] %s170_s21 }
   0xa   :  { %218 = vmatpush3.xpose.msk.msra.mxu0 %vm35_vm0, %v30_v3  ;;  %s255_s1 = scalar_lea.vmem %s171_s21, 16  ;;  %s259_s22 = scalar_lea.vmem %s171_s21, 32 }
   0xb   :  { %219 = vmatprep.subr.mxu0 %v277_v1  ;;  %p256_p0 = scmp.ne.s32.totalorder %s171_s21, %s255_s1  ;;  %p260_p1 = scmp.lt.s32.totalorder %s171_s21, %s171_s21 }
   0xc   :  { %p261_p2 = scmp.lt.s32.totalorder %s259_s22, %s255_s1 }
   0xe   :  { %220 = vmatpush3.xpose.msk.msra.mxu0 %vm35_vm0, %v29_v4  ;;  %p262_p3 = por %p261_p2, %p260_p1 }
   0xf   :  { %221 = vmatprep.subr.mxu0 %v277_v1 }
  0x10   :  { %p263_p4 = pnand %p262_p3, %p256_p0 }
  0x12   :  { %222 = vmatpush3.xpose.msk.msra.mxu0 %vm35_vm0, %v28_v5 }
  0x13   :  { %223 = vmatprep.subr.mxu0 %v277_v1 }
  0x16   :  { %224 = vmatpush3.xpose.msk.msra.mxu0 %vm35_vm0, %v27_v6 }
  0x17   :  { %225 = vmatprep.subr.mxu0 %v277_v1 }
  0x1a   :  { %226 = vmatpush3.xpose.msk.msra.mxu0 %vm35_vm0, %v26_v7 }
  0x1b   :  { %227 = vmatprep.subr.mxu0 %v277_v1 }
  0x1e   :  { %228 = vmatpush3.xpose.msk.msra.mxu0 %vm35_vm0, %v25_v8 }
  0x1f   :  { %229 = vmatprep.subr.mxu0 %v277_v1 }
  0x22   :  { %230 = vmatpush3.xpose.msk.msra.mxu0 %vm35_vm0, %v24_v9 }
  0x23   :  { %231 = vmatprep.subr.mxu0 %v277_v1 }
  0x26   :  { %232 = vmatpush3.xpose.msk.msra.mxu0 %vm35_vm0, %v23_v10 }
  0x27   :  { %233 = vmatprep.subr.mxu0 %v277_v1 }
  0x2a   :  { %234 = vmatpush3.xpose.msk.msra.mxu0 %vm35_vm0, %v22_v11 }
  0x2b   :  { %235 = vmatprep.subr.mxu0 %v277_v1 }
  0x2e   :  { %236 = vmatpush3.xpose.msk.msra.mxu0 %vm35_vm0, %v21_v12 }
  0x2f   :  { %237 = vmatprep.subr.mxu0 %v277_v1 }
  0x32   :  { %238 = vmatpush3.xpose.msk.msra.mxu0 %vm35_vm0, %v20_v13 }
  0x33   :  { %239 = vmatprep.subr.mxu0 %v277_v1 }
  0x36   :  { %240 = vmatpush3.xpose.msk.msra.mxu0 %vm35_vm0, %v19_v14 }
  0x37   :  { %241 = vmatprep.subr.mxu0 %v277_v1 }
  0x3a   :  { %242 = vmatpush3.xpose.msk.msra.mxu0 %vm35_vm0, %v18_v15 }
  0x3b   :  { %243 = vmatprep.subr.mxu0 %v277_v1 }
  0x3e   :  { %244 = vmatpush3.xpose.msk.msra.mxu0 %vm35_vm0, %v17_v16 }
  0x41   :  { %246 = vmatmul.mubr.msk.f32.vlgmr.msra.gmra.mxu0 %vm35_vm0, %v16_v17 }
 0x101   :  { %v153_v19 = vpop.f32.mrf.mxu0 }
 0x102   :  { %v154_v20 = vadd.f32 %v153_v19, %v34_v18 }
 0x103   :  { %v247_v21 = vpop.f32.mrf.mxu0 }
 0x104   :  { %v195_v22 = vmul.f32 -1.442695, %v154_v20 }
 0x106   :  { %251 = vpow2.f32 %v195_v22 }
 0x113   :  { %v252_v23 = vpop.eup %251 }
 0x114   :  { %v160_v24 = vadd.f32 1.0, %v252_v23 }
 0x116   :  { %253 = vrcp.f32 %v160_v24 }
 0x123   :  { %v254_v25 = vpop.eup %253 }
 0x124   :  { %163 = vst [vmem:[#allocation3] sm:$0x1] %v254_v25 }
 0x125   :  { %266 = shalt.err (!%p263_p4)
}
 0x126   :  { %173 = dma.vmem_to_hbm [thread:$0]  %s171_s21, 16, %s377_s3, [#allocation4]  }
 0x127   :  { %275 = dma.done.wait [#allocation4], 16  }
 0x128   :  { %276 = vsyncadd [#allocation4], 4294967280 }
 0x129   :  { %177 = vsyncpa [#allocation4], 1 }

</bundles_post_ra>
